<compile_context>
chip_gen: v7x
topology: tpu7x:2x2x1
jax: 0.10.0
libtpu: 0.0.40
codegen_flags: <defaults>
</compile_context>

<pallas_src>
import jax
import jax.numpy as jnp
from jax.experimental import pallas as pl
from jax.experimental.pallas import tpu as pltpu


def _mlp_kernel(x_ref, w1_ref, b1_ref, w2_ref, b2_ref, o_ref):
    # fc1 on the MXU (f32 accumulate), bias + ReLU on the VPU in f32.
    h = jnp.dot(x_ref[...], w1_ref[...], preferred_element_type=jnp.float32)
    h = jnp.maximum(h + b1_ref[...], 0.0)                       # (tb, dense)
    # fc2 on the MXU (f32 accumulate) + bias; downcast only at the store.
    y = jnp.dot(h.astype(w2_ref.dtype), w2_ref[...],
                preferred_element_type=jnp.float32)
    o_ref[...] = (y + b2_ref[...]).astype(o_ref.dtype)


def _round_up(n, m):
    return ((n + m - 1) // m) * m


def prepare_params(w1, b1, w2, b2, *, param_dtype=None):
    """One-time parameter prep (hoisted out of the per-call forward).

    w1: (input_size, dense); b1: (dense,); w2: (dense, n_out); b2: (n_out,).
    Pads the tiny output-feature dim (5 -> 8) and reshapes biases to 2-D rows.
    """
    dense = w1.shape[1]
    n_out = w2.shape[1]
    n_out_p = max(8, _round_up(n_out, 8))      # 5 -> 8 output lanes

    b1p = b1.astype(jnp.float32).reshape(1, dense)
    w2p = jnp.zeros((dense, n_out_p), w2.dtype).at[:, :n_out].set(w2)
    b2p = jnp.zeros((1, n_out_p), jnp.float32).at[0, :n_out].set(
        b2.astype(jnp.float32))

    if param_dtype is not None:                # optional bf16 MXU weights
        w1 = w1.astype(param_dtype)
        w2p = w2p.astype(param_dtype)

    return (w1, b1p, w2p, b2p, n_out)


def net_classify_forward(x, params, *, tb=None):
    """x: (B, input_size); params from prepare_params().  Returns (B, n_out)."""
    w1, b1p, w2p, b2p, n_out = params
    B, in_dim = x.shape
    dense = w1.shape[1]
    n_out_p = w2p.shape[1]
    out_dtype = x.dtype

    # ---- batch tile selection (no explicit x padding) -----------------------
    B8 = _round_up(max(B, 1), 8)
    if tb is None:
        tb = min(4096, B8)
        # Keep the grid at >= 2 steps when there is enough work so the
        # "parallel" batch axis can shard across v7x's two TensorCores.
        if tb >= B8 and B8 >= 16:
            tb = _round_up((B8 + 1) // 2, 8)
    tb = max(8, (tb // 8) * 8)
    grid = (pl.cdiv(B, tb),)

    in_item = jnp.dtype(x.dtype).itemsize
    w_item = jnp.dtype(w1.dtype).itemsize
    out_item = jnp.dtype(out_dtype).itemsize
    cost = pl.CostEstimate(
        flops=2 * B * (in_dim * dense + dense * n_out_p),
        transcendentals=0,
        bytes_accessed=(B * in_dim * in_item
                        + B * n_out_p * out_item
                        + (in_dim * dense + dense * n_out_p) * w_item
                        + (dense + n_out_p) * 4),
    )

    out_padded = pl.pallas_call(
        _mlp_kernel,
        out_shape=jax.ShapeDtypeStruct((B, n_out_p), out_dtype),
        grid_spec=pltpu.PrefetchScalarGridSpec(
            num_scalar_prefetch=0,
            grid=grid,
            in_specs=[
                pl.BlockSpec((tb, in_dim), lambda i: (i, 0)),       # x tile
                pl.BlockSpec((in_dim, dense), lambda i: (0, 0)),    # W1 (resident)
                pl.BlockSpec((1, dense), lambda i: (0, 0)),         # b1
                pl.BlockSpec((dense, n_out_p), lambda i: (0, 0)),   # W2 (resident)
                pl.BlockSpec((1, n_out_p), lambda i: (0, 0)),       # b2
            ],
            out_specs=pl.BlockSpec((tb, n_out_p), lambda i: (i, 0)),
        ),
        compiler_params=pltpu.CompilerParams(
            dimension_semantics=("parallel",),
            vmem_limit_bytes=32 * 1024 * 1024),
        cost_estimate=cost,
    )(x, w1, b1p, w2p, b2p)

    # Strip only the zero-padded output lanes (5..7); no batch padding existed.
    return out_padded[:, :n_out]


def _reference(x, w1, b1, w2, b2):
    h = jnp.maximum(x @ w1 + b1, 0.0)
    return h @ w2 + b2


if __name__ == "__main__":
    # Small shapes consistent with the module: input_size=32, dense=64, out=5.
    # B=12 (not a multiple of 8) exercises the partial tail-tile path.
    B, input_size, dense, n_out = 12, 32, 64, 5

    key = jax.random.PRNGKey(0)
    kx, k1, kb1, k2, kb2 = jax.random.split(key, 5)

    x = jax.random.normal(kx, (B, input_size), dtype=jnp.float32)

    # Deterministic synthetic parameters (nn.Linear weights stored transposed
    # as (in_features, out_features)).
    w1 = jax.random.normal(k1, (input_size, dense), dtype=jnp.float32) * 0.1
    b1 = jax.random.normal(kb1, (dense,), dtype=jnp.float32) * 0.1
    w2 = jax.random.normal(k2, (dense, n_out), dtype=jnp.float32) * 0.1
    b2 = jax.random.normal(kb2, (n_out,), dtype=jnp.float32) * 0.1

    params = prepare_params(w1, b1, w2, b2)     # one-time, cached by the caller
    out = net_classify_forward(x, params)
    out = jax.block_until_ready(out)

    ref = _reference(x, w1, b1, w2, b2)
    assert out.shape == (B, n_out)
    assert jnp.allclose(out, ref, atol=1e-5, rtol=1e-5), "mismatch vs reference"

    print("KERNEL_OK")
</pallas_src>

<mosaic_0001>
module attributes {stable_mosaic.version = 11 : i64} {
  func.func @_mlp_kernel(%arg0: i32, %arg1: memref<8x32xf32, #tpu.memory_space<vmem>>, %arg2: memref<32x64xf32, #tpu.memory_space<vmem>>, %arg3: memref<1x64xf32, #tpu.memory_space<vmem>>, %arg4: memref<64x8xf32, #tpu.memory_space<vmem>>, %arg5: memref<1x8xf32, #tpu.memory_space<vmem>>, %arg6: memref<8x8xf32, #tpu.memory_space<vmem>>) attributes {dimension_semantics = [#tpu.dimension_semantics<parallel>], iteration_bounds = array<i64: 2>, scalar_prefetch = 0 : i64, scratch_operands = 0 : i64, tpu.core_type = #tpu.core_type<tc>, window_params = [{transform_indices = @transform_0, window_bounds = array<i64: 8, 32>}, {pipeline_mode = #tpu.pipeline_mode<synchronous>, transform_indices = @transform_1, window_bounds = array<i64: 32, 64>}, {pipeline_mode = #tpu.pipeline_mode<synchronous>, transform_indices = @transform_2, window_bounds = array<i64: 1, 64>}, {pipeline_mode = #tpu.pipeline_mode<synchronous>, transform_indices = @transform_3, window_bounds = array<i64: 64, 8>}, {pipeline_mode = #tpu.pipeline_mode<synchronous>, transform_indices = @transform_4, window_bounds = array<i64: 1, 8>}, {transform_indices = @transform_5, window_bounds = array<i64: 8, 8>}]} {
    %c0 = arith.constant 0 : index
    %c0_0 = arith.constant 0 : index
    %0 = vector.load %arg1[%c0, %c0_0] : memref<8x32xf32, #tpu.memory_space<vmem>>, vector<8x32xf32>
    %c0_1 = arith.constant 0 : index
    %c0_2 = arith.constant 0 : index
    %1 = vector.load %arg2[%c0_1, %c0_2] : memref<32x64xf32, #tpu.memory_space<vmem>>, vector<32x64xf32>
    %cst = arith.constant dense<0.000000e+00> : vector<8x64xf32>
    %2 = tpu.matmul %0, %1, %cst {dimension_numbers = #tpu.dot_dimension_numbers<[1], [0], [0], [1], [0, 0, 1, 1], [], []>} : vector<8x32xf32>, vector<32x64xf32>, vector<8x64xf32> -> vector<8x64xf32>
    %c0_3 = arith.constant 0 : index
    %c0_4 = arith.constant 0 : index
    %3 = vector.load %arg3[%c0_3, %c0_4] : memref<1x64xf32, #tpu.memory_space<vmem>>, vector<1x64xf32>
    %4 = vector.broadcast %3 : vector<1x64xf32> to vector<8x64xf32>
    %5 = arith.addf %2, %4 : vector<8x64xf32>
    %cst_5 = arith.constant 0.000000e+00 : f32
    %6 = vector.broadcast %cst_5 : f32 to vector<8x64xf32>
    %7 = arith.maximumf %5, %6 : vector<8x64xf32>
    %c0_6 = arith.constant 0 : index
    %c0_7 = arith.constant 0 : index
    %8 = vector.load %arg4[%c0_6, %c0_7] : memref<64x8xf32, #tpu.memory_space<vmem>>, vector<64x8xf32>
    %cst_8 = arith.constant dense<0.000000e+00> : vector<8x8xf32>
    %9 = tpu.matmul %7, %8, %cst_8 {dimension_numbers = #tpu.dot_dimension_numbers<[1], [0], [0], [1], [0, 0, 1, 1], [], []>} : vector<8x64xf32>, vector<64x8xf32>, vector<8x8xf32> -> vector<8x8xf32>
    %c0_9 = arith.constant 0 : index
    %c0_10 = arith.constant 0 : index
    %10 = vector.load %arg5[%c0_9, %c0_10] : memref<1x8xf32, #tpu.memory_space<vmem>>, vector<1x8xf32>
    %11 = vector.broadcast %10 : vector<1x8xf32> to vector<8x8xf32>
    %12 = arith.addf %9, %11 : vector<8x8xf32>
    %c0_11 = arith.constant 0 : index
    %c0_12 = arith.constant 0 : index
    %13 = vector.load %arg6[%c0_11, %c0_12] : memref<8x8xf32, #tpu.memory_space<vmem>>, vector<8x8xf32>
    tpu.vector_store %arg6[%c0_11, %c0_12], %12 {strides = array<i32>} : memref<8x8xf32, #tpu.memory_space<vmem>>, vector<8x8xf32>,
    return
  }
  func.func @transform_0(%arg0: i32) -> (i32, i32) {
    %c0_i32 = arith.constant 0 : i32
    %c0_i32_0 = arith.constant 0 : i32
    return %arg0, %c0_i32 : i32, i32
  }
  func.func @transform_1(%arg0: i32) -> (i32, i32) {
    %c0_i32 = arith.constant 0 : i32
    %c0_i32_0 = arith.constant 0 : i32
    %c0_i32_1 = arith.constant 0 : i32
    return %c0_i32, %c0_i32_0 : i32, i32
  }
  func.func @transform_2(%arg0: i32) -> (i32, i32) {
    %c0_i32 = arith.constant 0 : i32
    %c0_i32_0 = arith.constant 0 : i32
    %c0_i32_1 = arith.constant 0 : i32
    return %c0_i32, %c0_i32_0 : i32, i32
  }
  func.func @transform_3(%arg0: i32) -> (i32, i32) {
    %c0_i32 = arith.constant 0 : i32
    %c0_i32_0 = arith.constant 0 : i32
    %c0_i32_1 = arith.constant 0 : i32
    return %c0_i32, %c0_i32_0 : i32, i32
  }
  func.func @transform_4(%arg0: i32) -> (i32, i32) {
    %c0_i32 = arith.constant 0 : i32
    %c0_i32_0 = arith.constant 0 : i32
    %c0_i32_1 = arith.constant 0 : i32
    return %c0_i32, %c0_i32_0 : i32, i32
  }
  func.func @transform_5(%arg0: i32) -> (i32, i32) {
    %c0_i32 = arith.constant 0 : i32
    %c0_i32_0 = arith.constant 0 : i32
    return %arg0, %c0_i32 : i32, i32
  }
}

</mosaic_0001>

<bundles_post_ra>
// kernel: tpu_custom_call.1
= control target key start
LH: loop header
LB: loop body
LE: loop exit
PB: predicated region body
PF: predicated region fallthrough
CT: control target
= control target key end

     0   :  { %s578_s18 = smov 0   ;;  %s640_s0 = inlined_call_operand.vmem [shape: f32[12,32], index: 0, kind: input, shape index: {}]   ;;  %s641_s1 = inlined_call_operand.vmem [shape: f32[32,64], index: 1, kind: input, shape index: {}]   ;;  %s642_s2 = inlined_call_operand.vmem [shape: f32[1,64], index: 2, kind: input, shape index: {}]   ;;  %s643_s3 = inlined_call_operand.vmem [shape: f32[64,8], index: 3, kind: input, shape index: {}]   ;;  %s644_s4 = inlined_call_operand.vmem [shape: f32[1,8], index: 4, kind: input, shape index: {}]   ;;  %s645_s5 = inlined_call_operand.vmem [shape: f32[12,8], index: 5, kind: output, shape index: {}]  }
   0x1 LB: > { %s451_s19 = sadd.s32 4294967295, %s543_s18   ;;  %p455_p0 = scmp.ge.s32.totalorder %s543_s18, 1  ;;  %s543_s18 = sphi %s578_s18, %s15_s18  }
   0x2   : > { %p186_p1 = scmp.lt.s32.totalorder %s543_s18, 3 }
   0x4   : > { %p187_p2 = pnand %p455_p0, %p186_p1 }
   0x5   : > { %v221_v0 = vld [vmem:[%s641_s1] sm:$0xff] (!%p187_p2)  ;;  %v222_v1 = vld [vmem:[%s641_s1 + $0x8] sm:$0xff] (!%p187_p2)  ;;  %v223_v2 = vld [vmem:[%s641_s1 + $0x10] sm:$0xff] (!%p187_p2)  ;;  %v545_v3 = vmov (!%p187_p2), 0.0|0.0   ;;  %vm546_vm0 = vmmov (!%p187_p2), 0   ;;  %v547_v6 = vmov (!%p187_p2), 0.0  }
   0x6   : > { %190 = sbr.rel (%p187_p2) target bundleno = 448 (0x1c0), region = 40  ;;  %508 = vmatprep.subr.bf16.mxu0 (!%p187_p2), %v545_v3  ;;  %v509_v4 = vpack.c.bf16 (!%p187_p2), %v222_v1, %v221_v0  ;;  %v224_v5 = vld [vmem:[%s641_s1 + $0x18] sm:$0xff] (!%p187_p2)  ;;  %486 = vmatprep.mubr.msk.f32.mxu0 (!%p187_p2), %vm546_vm0, %v547_v6  ;;  %p212_p3 = scmp.lt.s32.totalorder (!%p187_p2), %s451_s19, 1  ;;  %v307_v7 = vld [vmem:[%s643_s3] sm:$0xff] (!%p187_p2)  ;;  %v308_v8 = vld [vmem:[%s643_s3 + $0x8] sm:$0xff] (!%p187_p2)  ;;  %vm232_vm1 = vcmask (!%p187_p2), 261120  }
   0x7   : > { %514 = vmatprep.subr.bf16.mxu1 (!%p187_p2), %v545_v3  ;;  %v515_v9 = vpack.c.bf16 (!%p187_p2), %v308_v8, %v307_v7  ;;  %v309_v10 = vld [vmem:[%s643_s3 + $0x10] sm:$0xff] (!%p187_p2)  ;;  %v310_v11 = vld [vmem:[%s643_s3 + $0x18] sm:$0xff] (!%p187_p2)  ;;  %505 = vmatprep.mubr.msk.f32.mxu1 (!%p187_p2), %vm546_vm0, %v547_v6  ;;  %v512_v12 = vpack.c.bf16 (!%p187_p2), %v224_v5, %v223_v2  ;;  %v311_v14 = vld [vmem:[%s643_s3 + $0x20] sm:$0xff] (!%p187_p2)  ;;  %vm322_vm2 = vcmask (!%p187_p2), 523264   ;;  %vm396_vm3 = vcmask (!%p187_p2), 64512  }
   0x8   : > { %510 = vmatpush3.bf16.msra.mxu0 (!%p187_p2), %v509_v4  ;;  %v518_v13 = vpack.c.bf16 (!%p187_p2), %v310_v11, %v309_v10  ;;  %v312_v15 = vld [vmem:[%s643_s3 + $0x28] sm:$0xff] (!%p187_p2)  ;;  %v313_v18 = vld [vmem:[%s643_s3 + $0x30] sm:$0xff] (!%p187_p2)  ;;  %v314_v19 = vld [vmem:[%s643_s3 + $0x38] sm:$0xff] (!%p187_p2) }
   0x9   : > { %511 = vmatprep.subr.bf16.mxu0 (!%p187_p2), %v545_v3  ;;  %516 = vmatpush3.bf16.msra.mxu1 (!%p187_p2), %v515_v9  ;;  %v521_v17 = vpack.c.bf16 (!%p187_p2), %v312_v15, %v311_v14  ;;  %v524_v20 = vpack.c.bf16 (!%p187_p2), %v314_v19, %v313_v18  ;;  %v458_v21 = vld [vmem:[%s642_s2] ss:$0 sm:$0xff] (!%p187_p2) }
   0xa   : > { %517 = vmatprep.subr.bf16.mxu1 (!%p187_p2), %v545_v3  ;;  %v460_v26 = vld [vmem:[%s644_s4] ss:$0 sm:$0xff] (!%p187_p2) }
   0xc   : > { %513 = vmatpush3.bf16.msra.mxu0 (!%p187_p2), %v512_v12 }
   0xd   : > { %s647_s19 = smov (!%p212_p3, %s451_s19), 1  ;;  %519 = vmatpush3.bf16.msra.mxu1 %v518_v13 }
   0xe   : > { %s456_s11 = sshll.u32 %s647_s19, 3  ;;  %520 = vmatprep.subr.bf16.mxu1 %v545_v3 }
   0xf   : > { %s215_s20 = scalar_lea.vmem %s640_s0, %s456_s11  ;;  %s219_s30 = scalar_lea.vmem %s645_s5, %s456_s11 }
  0x10   : > { %v220_v16 = vld [vmem:[%s215_s20] sm:$0xff] }
  0x11   : > { %487 = vmatmul.mubr.msk.f32.vlgmr.msra.gmra.mrb[0].mxu0 %vm232_vm1, %v220_v16  ;;  %522 = vmatpush3.bf16.msra.mxu1 %v521_v17 }
  0x12   : > { %523 = vmatprep.subr.bf16.mxu1 %v545_v3 }
  0x15   : > { %525 = vmatpush3.bf16.msra.mxu1 %v524_v20 }
  0xe4   : > { %v302_v22 = vpop.f32.mrb[0].mxu0 }
  0xe5   : > { %v303_v23 = vadd.f32 %v458_v21, %v302_v22  ;;  %v488_v24 = vpop.f32.mrb[1].mxu0 }
  0xe7   : > { %v306_v25 = vmax.f32 %v303_v23, 0.0 }
  0xe9   : > { %506 = vmatmul.mubr.msk.f32.vlgmr.msra.gmra.mrb[0].mxu1 %vm322_vm2, %v306_v25 }
 0x1bc   : > { %v392_v27 = vpop.f32.mrb[0].mxu1 }
 0x1bd   : > { %v393_v28 = vadd.f32 %v460_v26, %v392_v27  ;;  %v507_v29 = vpop.f32.mrb[1].mxu1 }
 0x1bf   : > { %397 = vst.msk [vmem:[%s219_s30] sm:$0xff] %vm396_vm3, %v393_v28 }
 0x1c0 PF: > { %s15_s18 = sadd.s32 1, %s543_s18  }
 0x1c1   : > { %p12_p4 = scmp.ge.s32.totalorder %s15_s18, 4  }
 0x1c3   :  { %14 = sbr.rel (!%p12_p4) target bundleno = 1 (0x1), region = 70 }

</bundles_post_ra>
